<compile_context>
chip_gen: v6e
topology: v6e:2x2x1
jax: 0.10.0
libtpu: 0.0.40
codegen_flags: <defaults>
</compile_context>

<pallas_src>
import jax
import jax.numpy as jnp
from jax.experimental import pallas as pl
from jax.experimental.pallas import tpu as pltpu


def _dma_copy_kernel(tree_ref, out_ref, sem):
    # Single HBM -> HBM async DMA of the whole tree tensor; no VMEM staging.
    # TODO(synk): chunk with pl.loop only if a single descriptor ever becomes
    # a scheduling concern for extremely large trees; one DMA is optimal here.
    cp = pltpu.make_async_copy(tree_ref, out_ref, sem)
    cp.start()
    cp.wait()


def _tree_copy(tree):
    """Materialized identity copy of `tree` into a DISTINCT HBM buffer.

    Grid-less pallas_call; both operands stay in HBM (memory_space=pl.ANY) and
    the kernel issues one DMA.  Works unchanged for any shape/dtype and on
    v5e / v6e / v7x since it uses no VMEM scratch.
    """
    return pl.pallas_call(
        _dma_copy_kernel,
        out_shape=jax.ShapeDtypeStruct(tree.shape, tree.dtype),
        in_specs=[pl.BlockSpec(memory_space=pl.ANY)],
        out_specs=pl.BlockSpec(memory_space=pl.ANY),
        scratch_shapes=[pltpu.SemaphoreType.DMA],
    )(tree)


def r3nn_forward(dsl, embedded_samples, tree, *, materialize=False):
    """Pallas equivalent of R3NN.forward(dsl, embedded_samples, tree) -> tree.

    `dsl` and `embedded_samples` are unused, matching the PyTorch semantics.
    Default path returns `tree` with zero data movement (the forward is a pure
    identity).  Set `materialize=True` only if a genuinely distinct output
    buffer is required downstream; that path runs a single HBM->HBM DMA.
    """
    del dsl, embedded_samples  # unused by the reference forward pass
    if not materialize:
        return tree
    return _tree_copy(tree)


if __name__ == "__main__":
    key = jax.random.PRNGKey(0)
    k1, k2, k3 = jax.random.split(key, 3)

    # Small, deterministic example inputs consistent with the module:
    #   dsl               : integer ids of grammar production rules
    #   embedded_samples  : I/O example encodings (batch, hidden)
    #   tree              : partial-program-tree node representations (nodes, hidden)
    dsl = jax.random.randint(k1, (8,), 0, 16, dtype=jnp.int32)
    embedded_samples = jax.random.normal(k2, (2, 32), dtype=jnp.float32)
    tree = jax.random.normal(k3, (8, 128), dtype=jnp.float32)

    # Preferred (default) path: kernel elided, exact identity, zero HBM traffic.
    out_fast = r3nn_forward(dsl, embedded_samples, tree)
    assert out_fast.shape == tree.shape and out_fast.dtype == tree.dtype
    assert bool(jnp.all(out_fast == tree))

    # Materialized path: exercises the HBM->HBM DMA copy kernel once and
    # produces a distinct buffer (no input/output aliasing).
    out = r3nn_forward(dsl, embedded_samples, tree, materialize=True)
    out = jax.block_until_ready(out)

    # Forward is identity on `tree`: verify exact reproduction in the new buffer.
    assert out.shape == tree.shape and out.dtype == tree.dtype
    assert bool(jnp.all(out == tree))
    # `tree` must remain valid/unchanged (no donation, no aliasing).
    assert bool(jnp.all(tree == out_fast))

    print("KERNEL_OK")
</pallas_src>

<mosaic_0001>
module attributes {stable_mosaic.version = 11 : i64} {
  func.func @_dma_copy_kernel(%arg0: memref<8x128xf32, #tpu.memory_space<any>>, %arg1: memref<8x128xf32, #tpu.memory_space<any>>, %arg2: memref<!tpu.dma_semaphore, #tpu.memory_space<semaphore_mem>>) attributes {dimension_semantics = [], scalar_prefetch = 0 : i64, scratch_operands = 1 : i64, tpu.core_type = #tpu.core_type<tc>} {
    tpu.enqueue_dma source(%arg0 : memref<8x128xf32, #tpu.memory_space<any>>) target(%arg1 : memref<8x128xf32, #tpu.memory_space<any>>) target_semaphore(%arg2 : memref<!tpu.dma_semaphore, #tpu.memory_space<semaphore_mem>>)
    tpu.wait_dma2 semaphore(%arg2 : memref<!tpu.dma_semaphore, #tpu.memory_space<semaphore_mem>>) src(%arg0 : memref<8x128xf32, #tpu.memory_space<any>>) dst(%arg1 : memref<8x128xf32, #tpu.memory_space<any>>)
    return
  }
}

</mosaic_0001>

<bundles_post_ra>
// kernel: tpu_custom_call.1
= control target key start
LH: loop header
LB: loop body
LE: loop exit
PB: predicated region body
PF: predicated region fallthrough
CT: control target
= control target key end

     0   :  { %s28_s6 = smov [#allocation2]   ;;  %s29_s7 = smov 131072   ;;  %s47_s0 = inlined_call_operand.hbm [shape: f32[8,128], index: 0, kind: input, shape index: {}]   ;;  %s48_s1 = inlined_call_operand.hbm [shape: f32[8,128], index: 1, kind: output, shape index: {}]  }
   0x1   :  { %s30_s8 = smov 0  }
   0x2   :  { %12 = dma.general %s47_s0, 128, %s48_s1, %s28_s6, %s29_s7, [#allocation4], %s30_s8, 0  }
   0x3   :  { %26 = dma.done.wait [#allocation2], 128 }
   0x4   :  { %27 = vsyncadd [#allocation2], 4294967168 }
   0x5   :  { %16 = vsyncmov [#allocation2] }
   0x8   :  { %s17_s13 = vpop.sfrf %16 }
   0x9   :  { %p22_p0 = scmp.ne.s32.totalorder %s17_s13, 0 }
   0xb   :  { %21 = shalt.err (%p22_p0)  }

</bundles_post_ra>
